<compile_context>
chip_gen: v5e
topology: v5e:2x2
jax: 0.10.0
libtpu: 0.0.40
codegen_flags: <defaults>
</compile_context>

<pallas_src>
import functools

import jax
import jax.numpy as jnp
from jax.experimental import pallas as pl
from jax.experimental.pallas import tpu as pltpu


def _sdpa_kernel(q_ref, k_ref, v_ref, out_ref, attn_ref, *, inv_temperature):
    # Block views: q_ref (1, TQ, D), k_ref (1, Lk, D), v_ref (1, Lk, Dv),
    #              out_ref (1, TQ, Dv), attn_ref (1, TQ, Lk).
    q = q_ref[0]
    k = k_ref[0]
    v = v_ref[0]

    # scores = (q @ k^T) / temperature -- native-dtype MXU operands with f32
    # accumulation; the scale is applied to the f32 scores for parity with the
    # torch reference (no extra rounding of q in its storage dtype).
    scores = jax.lax.dot_general(
        q, k,
        dimension_numbers=(((1,), (1,)), ((), ())),
        preferred_element_type=jnp.float32,
    ) * inv_temperature

    # Numerically stable, *exact* softmax along the key axis (dim=2 in torch).
    m = jnp.max(scores, axis=-1, keepdims=True)
    e = jnp.exp(scores - m)
    attn = e / jnp.sum(e, axis=-1, keepdims=True)

    # Cast the probabilities once; reuse for both the PV matmul and the store.
    p = attn.astype(v_ref.dtype)
    out = jnp.dot(p, v, preferred_element_type=jnp.float32)

    out_ref[0] = out.astype(out_ref.dtype)
    if attn_ref.dtype == v_ref.dtype:
        attn_ref[0] = p                       # no second pack pass
    else:
        attn_ref[0] = attn.astype(attn_ref.dtype)


def _sdpa_kernel_no_attn(q_ref, k_ref, v_ref, out_ref, *, inv_temperature):
    # Fast path: no (TQ, Lk) attn writeback; normalization deferred until after
    # the PV matmul so the per-element divide is TQ x Dv instead of TQ x Lk.
    q = q_ref[0]
    k = k_ref[0]
    v = v_ref[0]

    scores = jax.lax.dot_general(
        q, k,
        dimension_numbers=(((1,), (1,)), ((), ())),
        preferred_element_type=jnp.float32,
    ) * inv_temperature

    m = jnp.max(scores, axis=-1, keepdims=True)
    e = jnp.exp(scores - m)
    denom = jnp.sum(e, axis=-1, keepdims=True)

    pv = jnp.dot(e.astype(v_ref.dtype), v, preferred_element_type=jnp.float32)
    out_ref[0] = (pv / denom).astype(out_ref.dtype)


def _vmem_budget_bytes():
    """~75% of the chip's VMEM capacity; conservative v7x-sized fallback."""
    try:
        cap = int(pltpu.get_tpu_info().vmem_capacity_bytes)
    except Exception:
        cap = 64 * 1024 * 1024
    return (3 * cap) // 4


def _vmem_bytes(tq, lk, d, dv, itemsize, with_attn):
    kv = lk * (d + dv) * itemsize              # k/v: single-buffered (Buffered(1))
    qb = 2 * tq * d * itemsize                 # q: double-buffered
    ob = 2 * tq * dv * itemsize                # out: double-buffered
    ab = 2 * tq * lk * itemsize if with_attn else 0
    scratch = 2 * tq * lk * 4                  # f32 scores / exp intermediates
    return kv + qb + ob + ab + scratch


def _pick_tq(lq, fits):
    # Sublane-aligned (multiple-of-8) q tiles; 256+ fills the v6e/v7x MXU,
    # smaller tiles bound the (tq, Lk) scores scratch for long contexts.
    for t in (512, 256, 128, 64, 32, 16, 8):
        if t <= lq and fits(t):
            return t
    return lq if lq < 8 else 8


def scaled_dot_product_attention(q, k, v, temperature, *, return_attn=True, tq=None):
    B, Lq, D = q.shape
    Bk, Lk, Dk = k.shape
    Bv, Lkv, Dv = v.shape
    assert B == Bk == Bv and D == Dk and Lk == Lkv

    itemsize = q.dtype.itemsize
    budget = _vmem_budget_bytes()
    fits = lambda t: _vmem_bytes(t, Lk, D, Dv, itemsize, return_attn) <= budget
    if tq is None:
        tq = _pick_tq(Lq, fits)
    assert tq == Lq or tq % 8 == 0, "q tile must be sublane-aligned or full-extent"

    grid = (B, pl.cdiv(Lq, tq))   # ragged Lq tail handled by a partial block

    in_specs = [
        pl.BlockSpec((1, tq, D), lambda b, i: (b, i, 0)),
        # k / v are reused across the whole Lq-tile axis; their block index
        # only changes with b, so single-buffer them and spend the VMEM on tq.
        pl.BlockSpec((1, Lk, D), lambda b, i: (b, 0, 0),
                     pipeline_mode=pl.Buffered(1)),
        pl.BlockSpec((1, Lk, Dv), lambda b, i: (b, 0, 0),
                     pipeline_mode=pl.Buffered(1)),
    ]
    out_spec = pl.BlockSpec((1, tq, Dv), lambda b, i: (b, i, 0))
    attn_spec = pl.BlockSpec((1, tq, Lk), lambda b, i: (b, i, 0))

    flops = 2 * B * Lq * Lk * (D + Dv)
    in_bytes = (q.size + k.size + v.size) * itemsize
    out_bytes = B * Lq * Dv * itemsize
    attn_bytes = B * Lq * Lk * itemsize if return_attn else 0
    cost = pl.CostEstimate(
        flops=flops,
        transcendentals=B * Lq * Lk,                  # exp per score
        bytes_accessed=in_bytes + out_bytes + attn_bytes,
    )

    compiler_params = pltpu.CompilerParams(
        # Batch leads the grid so a megacore split gives each TensorCore
        # disjoint k/v streams before splitting the Lq-tile axis.
        dimension_semantics=("parallel", "parallel"),
        vmem_limit_bytes=int(budget),
    )

    inv_t = 1.0 / float(temperature)

    if return_attn:
        out, attn = pl.pallas_call(
            functools.partial(_sdpa_kernel, inv_temperature=inv_t),
            out_shape=(
                jax.ShapeDtypeStruct((B, Lq, Dv), q.dtype),
                jax.ShapeDtypeStruct((B, Lq, Lk), q.dtype),
            ),
            grid=grid,
            in_specs=in_specs,
            out_specs=(out_spec, attn_spec),
            compiler_params=compiler_params,
            cost_estimate=cost,
        )(q, k, v)
        return out, attn

    out = pl.pallas_call(
        functools.partial(_sdpa_kernel_no_attn, inv_temperature=inv_t),
        out_shape=jax.ShapeDtypeStruct((B, Lq, Dv), q.dtype),
        grid=grid,
        in_specs=in_specs,
        out_specs=out_spec,
        compiler_params=compiler_params,
        cost_estimate=cost,
    )(q, k, v)
    return out


def _reference(q, k, v, temperature):
    # HIGHEST precision so the reference matmuls are true f32 even on TPU
    # (default TPU matmul precision would otherwise dominate the comparison).
    hp = jax.lax.Precision.HIGHEST
    attn = jnp.einsum("bqd,bkd->bqk", q, k, precision=hp) / temperature
    attn = jax.nn.softmax(attn, axis=2)
    out = jnp.einsum("bqk,bkd->bqd", attn, v, precision=hp)
    return out, attn


if __name__ == "__main__":
    key = jax.random.PRNGKey(0)
    kq, kk, kv = jax.random.split(key, 3)

    B, Lq, Lk, D, Dv = 2, 8, 8, 32, 32
    temperature = float(D) ** 0.5

    q = jax.random.normal(kq, (B, Lq, D), dtype=jnp.float32)
    k = jax.random.normal(kk, (B, Lk, D), dtype=jnp.float32)
    v = jax.random.normal(kv, (B, Lk, Dv), dtype=jnp.float32)

    ref_out, ref_attn = _reference(q, k, v, temperature)

    # 1) Default path: returns (output, attn) like the torch module.
    out, attn = scaled_dot_product_attention(q, k, v, temperature)
    out = jax.block_until_ready(out)
    attn = jax.block_until_ready(attn)
    assert jnp.allclose(out, ref_out, atol=2e-3, rtol=2e-3), "output mismatch"
    assert jnp.allclose(attn, ref_attn, atol=2e-3, rtol=2e-3), "attn mismatch"

    # 2) Fast path: attn writeback skipped, deferred normalization.
    out_fast = scaled_dot_product_attention(q, k, v, temperature, return_attn=False)
    out_fast = jax.block_until_ready(out_fast)
    assert jnp.allclose(out_fast, ref_out, atol=2e-3, rtol=2e-3), "fast path mismatch"

    # 3) Multi-tile Lq grid (forced tq=8) to exercise the tiled path.
    Lq2 = 16
    q2 = jax.random.normal(jax.random.PRNGKey(1), (B, Lq2, D), dtype=jnp.float32)
    ref_out2, ref_attn2 = _reference(q2, k, v, temperature)
    out2, attn2 = scaled_dot_product_attention(q2, k, v, temperature, tq=8)
    out2 = jax.block_until_ready(out2)
    attn2 = jax.block_until_ready(attn2)
    assert jnp.allclose(out2, ref_out2, atol=2e-3, rtol=2e-3), "tiled output mismatch"
    assert jnp.allclose(attn2, ref_attn2, atol=2e-3, rtol=2e-3), "tiled attn mismatch"

    print("KERNEL_OK")
</pallas_src>

<mosaic_0001>
module attributes {stable_mosaic.version = 11 : i64} {
  func.func @_sdpa_kernel(%arg0: i32, %arg1: i32, %arg2: memref<1x8x32xf32, #tpu.memory_space<vmem>>, %arg3: memref<1x8x32xf32, #tpu.memory_space<vmem>>, %arg4: memref<1x8x32xf32, #tpu.memory_space<vmem>>, %arg5: memref<1x8x32xf32, #tpu.memory_space<vmem>>, %arg6: memref<1x8x8xf32, #tpu.memory_space<vmem>>) attributes {dimension_semantics = [#tpu.dimension_semantics<parallel>, #tpu.dimension_semantics<parallel>], iteration_bounds = array<i64: 2, 1>, scalar_prefetch = 0 : i64, scratch_operands = 0 : i64, tpu.core_type = #tpu.core_type<tc>, window_params = [{transform_indices = @transform_0, window_bounds = array<i64: 1, 8, 32>}, {pipeline_mode = #tpu.pipeline_mode<synchronous>, transform_indices = @transform_1, window_bounds = array<i64: 1, 8, 32>}, {pipeline_mode = #tpu.pipeline_mode<synchronous>, transform_indices = @transform_2, window_bounds = array<i64: 1, 8, 32>}, {transform_indices = @transform_3, window_bounds = array<i64: 1, 8, 32>}, {transform_indices = @transform_4, window_bounds = array<i64: 1, 8, 8>}]} {
    %c0 = arith.constant 0 : index
    %c0_0 = arith.constant 0 : index
    %c0_1 = arith.constant 0 : index
    %0 = vector.load %arg2[%c0, %c0_0, %c0_1] : memref<1x8x32xf32, #tpu.memory_space<vmem>>, vector<1x8x32xf32>
    %1 = vector.shape_cast %0 : vector<1x8x32xf32> to vector<8x32xf32>
    %c0_2 = arith.constant 0 : index
    %c0_3 = arith.constant 0 : index
    %c0_4 = arith.constant 0 : index
    %2 = vector.load %arg3[%c0_2, %c0_3, %c0_4] : memref<1x8x32xf32, #tpu.memory_space<vmem>>, vector<1x8x32xf32>
    %3 = vector.shape_cast %2 : vector<1x8x32xf32> to vector<8x32xf32>
    %c0_5 = arith.constant 0 : index
    %c0_6 = arith.constant 0 : index
    %c0_7 = arith.constant 0 : index
    %4 = vector.load %arg4[%c0_5, %c0_6, %c0_7] : memref<1x8x32xf32, #tpu.memory_space<vmem>>, vector<1x8x32xf32>
    %5 = vector.shape_cast %4 : vector<1x8x32xf32> to vector<8x32xf32>
    %cst = arith.constant dense<0.000000e+00> : vector<8x8xf32>
    %6 = tpu.matmul %1, %3, %cst {dimension_numbers = #tpu.dot_dimension_numbers<[1], [1], [0], [0], [0, 0, 1, 0], [], []>} : vector<8x32xf32>, vector<8x32xf32>, vector<8x8xf32> -> vector<8x8xf32>
    %cst_8 = arith.constant 0.176776692 : f32
    %7 = vector.broadcast %cst_8 : f32 to vector<8x8xf32>
    %8 = arith.mulf %6, %7 : vector<8x8xf32>
    %cst_9 = arith.constant dense<0xFF800000> : vector<8xf32>
    %9 = vector.multi_reduction <maximumf>, %8, %cst_9 [1] : vector<8x8xf32> to vector<8xf32>
    %10 = vector.shape_cast %9 : vector<8xf32> to vector<8x1xf32>
    %11 = vector.broadcast %10 : vector<8x1xf32> to vector<8x8xf32>
    %12 = arith.subf %8, %11 : vector<8x8xf32>
    %13 = math.exp %12 : vector<8x8xf32>
    %cst_10 = arith.constant dense<0.000000e+00> : vector<8xf32>
    %14 = vector.multi_reduction <add>, %13, %cst_10 [1] : vector<8x8xf32> to vector<8xf32>
    %15 = vector.shape_cast %14 : vector<8xf32> to vector<8x1xf32>
    %16 = vector.broadcast %15 : vector<8x1xf32> to vector<8x8xf32>
    %17 = arith.divf %13, %16 : vector<8x8xf32>
    %cst_11 = arith.constant dense<0.000000e+00> : vector<8x32xf32>
    %18 = tpu.matmul %17, %5, %cst_11 {dimension_numbers = #tpu.dot_dimension_numbers<[1], [0], [0], [1], [0, 0, 1, 1], [], []>} : vector<8x8xf32>, vector<8x32xf32>, vector<8x32xf32> -> vector<8x32xf32>
    %c0_12 = arith.constant 0 : index
    %c0_13 = arith.constant 0 : index
    %c0_14 = arith.constant 0 : index
    %19 = vector.load %arg5[%c0_12, %c0_13, %c0_14] : memref<1x8x32xf32, #tpu.memory_space<vmem>>, vector<1x8x32xf32>
    %20 = vector.shape_cast %19 : vector<1x8x32xf32> to vector<8x32xf32>
    %21 = vector.shape_cast %18 : vector<8x32xf32> to vector<1x8x32xf32>
    tpu.vector_store %arg5[%c0_12, %c0_13, %c0_14], %21 {strides = array<i32>} : memref<1x8x32xf32, #tpu.memory_space<vmem>>, vector<1x8x32xf32>,
    %c0_15 = arith.constant 0 : index
    %c0_16 = arith.constant 0 : index
    %c0_17 = arith.constant 0 : index
    %22 = vector.load %arg6[%c0_15, %c0_16, %c0_17] : memref<1x8x8xf32, #tpu.memory_space<vmem>>, vector<1x8x8xf32>
    %23 = vector.shape_cast %22 : vector<1x8x8xf32> to vector<8x8xf32>
    %24 = vector.shape_cast %17 : vector<8x8xf32> to vector<1x8x8xf32>
    tpu.vector_store %arg6[%c0_15, %c0_16, %c0_17], %24 {strides = array<i32>} : memref<1x8x8xf32, #tpu.memory_space<vmem>>, vector<1x8x8xf32>,
    return
  }
  func.func @transform_0(%arg0: i32, %arg1: i32) -> (i32, i32, i32) {
    %c0_i32 = arith.constant 0 : i32
    %c0_i32_0 = arith.constant 0 : i32
    return %arg0, %arg1, %c0_i32 : i32, i32, i32
  }
  func.func @transform_1(%arg0: i32, %arg1: i32) -> (i32, i32, i32) {
    %c0_i32 = arith.constant 0 : i32
    %c0_i32_0 = arith.constant 0 : i32
    %c0_i32_1 = arith.constant 0 : i32
    return %arg0, %c0_i32, %c0_i32_0 : i32, i32, i32
  }
  func.func @transform_2(%arg0: i32, %arg1: i32) -> (i32, i32, i32) {
    %c0_i32 = arith.constant 0 : i32
    %c0_i32_0 = arith.constant 0 : i32
    %c0_i32_1 = arith.constant 0 : i32
    return %arg0, %c0_i32, %c0_i32_0 : i32, i32, i32
  }
  func.func @transform_3(%arg0: i32, %arg1: i32) -> (i32, i32, i32) {
    %c0_i32 = arith.constant 0 : i32
    %c0_i32_0 = arith.constant 0 : i32
    return %arg0, %arg1, %c0_i32 : i32, i32, i32
  }
  func.func @transform_4(%arg0: i32, %arg1: i32) -> (i32, i32, i32) {
    %c0_i32 = arith.constant 0 : i32
    %c0_i32_0 = arith.constant 0 : i32
    return %arg0, %arg1, %c0_i32 : i32, i32, i32
  }
}

</mosaic_0001>

<bundles_post_ra>
// kernel: tpu_custom_call.1
= control target key start
LH: loop header
LB: loop body
LE: loop exit
PB: predicated region body
PF: predicated region fallthrough
CT: control target
= control target key end

     0   :  { %10 = vsyncpa [#allocation3], 0  ;;  %s1089_s0 = inlined_call_operand.hbm [shape: f32[2,8,32], index: 0, kind: input, shape index: {}]   ;;  %s1090_s1 = inlined_call_operand.hbm [shape: f32[2,8,32], index: 1, kind: input, shape index: {}]   ;;  %s1091_s2 = inlined_call_operand.hbm [shape: f32[2,8,32], index: 2, kind: input, shape index: {}]   ;;  %s1092_s3 = inlined_call_operand.hbm [shape: f32[2,8,32], index: 3, kind: output, shape index: {0}]   ;;  %s1093_s4 = inlined_call_operand.hbm [shape: f32[2,8,8], index: 4, kind: output, shape index: {1}]  }
   0x1   :  { %12 = vsyncpa [#allocation3 + $0x1], 0 }
   0x2   :  { %13 = vsyncpa [#allocation6], 0 }
   0x3   :  { %14 = vsyncpa [#allocation4], 0 }
   0x4   :  { %16 = vsyncpa [#allocation4 + $0x1], 0 }
   0x5   :  { %17 = vsyncpa [#allocation10], 0 }
   0x6   :  { %19 = vsyncpa [#allocation10 + $0x1], 0  ;;  %s885_s15 = smov 0   ;;  %s887_s16 = smov 0  }
   0x7   :  { %s889_s17 = smov 0   ;;  %s891_s18 = smov 0  }
   0x8   :  { %s893_s19 = smov 0   ;;  %s895_s20 = smov 0  }
   0x9 LB: > { %s543_s21 = sadd.s32 4294967295, %s856_s20   ;;  %s544_s22 = sadd.s32 4294967294, %s856_s20   ;;  %s856_s20 = sphi %s895_s20, %s25_s20   ;;  %s852_s19 = sphi %s893_s19, %s1103_s19   ;;  %s848_s18 = sphi %s891_s18, %s1102_s18   ;;  %s844_s17 = sphi %s889_s17, %s1101_s17   ;;  %s840_s16 = sphi %s887_s16, %s1100_s16   ;;  %s836_s15 = sphi %s885_s15, %s1099_s15  }
   0xa   : > { %p59_p0 = scmp.ne.s32.totalorder %s840_s16, %s836_s15  ;;  %p60_p1 = scmp.eq.s32.totalorder %s543_s21, 0 }
   0xb   : > { %p143_p2 = scmp.eq.s32.totalorder %s544_s22, 1  ;;  %p545_p4 = scmp.ge.s32.totalorder %s856_s20, 1 }
   0xc   : > { %p919_p3 = por %p60_p1, %p59_p0  ;;  %p178_p6 = scmp.lt.s32.totalorder %s856_s20, 3 }
   0xd   : > { %p924_p5 = por %p143_p2, %p59_p0  ;;  %s929_s25 = sshll.u32 %s848_s18, 3 }
   0xe   : > { %p931_p7 = pnand %p545_p4, %p178_p6  ;;  %s190_s29 = scalar_lea.hbm %s1090_s1, %s929_s25 }
   0xf   : > { %s192_s30 = sshll.u32 %s190_s29, 4  ;;  %s858_s5 = smov [#allocation5]   ;;  %s193_s30 = int_to_ptr.hbm [resolvable:$true] %s192_s30 }
  0x10   : > { %s194_s6 = sshll.u32 %s858_s5, 4  ;;  %p574_p8 = pneg %p931_p7  ;;  %s195_s6 = int_to_ptr.vmem [resolvable:$true] %s194_s6 }
  0x11   : > { %p548_p9 = scmp.ge.s32.totalorder %s856_s20, 2  ;;  %s204_s10 = scalar_lea.hbm %s1091_s2, %s929_s25 }
  0x12   : > { %p944_p10 = pnand %p574_p8, %p919_p3  ;;  %s952_s11 = sshll.u32 %s204_s10, 4  ;;  %s207_s11 = int_to_ptr.hbm [resolvable:$true] %s952_s11 }
  0x13   : > { %s648_s12 = sshra.s32 %s193_s30, 4  ;;  %s655_s22 = scalar_lea.hbm %s1090_s1, 16  ;;  %s649_s12 = int_to_ptr.hbm [resolvable:$true] %s648_s12 }
  0x14   : > { %s650_s13 = scalar_lea.hbm %s649_s12, 8  ;;  %p652_p12 = pneg %p944_p10 }
  0x15   : > { %p651_p11 = scmp.ne.s32.totalorder %s649_s12, %s650_s13  ;;  %p656_p1 = scmp.lt.s32.totalorder %s649_s12, %s1090_s1 }
  0x16   : > { %p657_p2 = scmp.lt.s32.totalorder %s655_s22, %s650_s13 }
  0x17   : > { %p653_p13 = pnand %p652_p12, %p651_p11 }
  0x18   : > { %p658_p4 = por %p657_p2, %p656_p1 }
  0x19   : > { %p654_p0 = pneg %p653_p13 }
  0x1b   : > { %p659_p6 = pnand %p658_p4, %p654_p0 }
  0x1d   : > { %662 = shalt.err (!%p659_p6)
}
  0x1e   : > { %577 = dma.hbm_to_vmem [thread:$0]  (!%p944_p10), %s193_s30, 128, %s195_s6, [#allocation6]  }
  0x1f   : > { %s859_s29 = smov [#allocation7]   ;;  %s678_s8 = sshra.s32 %s207_s11, 4  ;;  %s679_s8 = int_to_ptr.hbm [resolvable:$true] %s678_s8 }
  0x20   : > { %s208_s5 = sshll.u32 %s859_s29, 4  ;;  %s680_s9 = scalar_lea.hbm %s679_s8, 8  ;;  %s209_s5 = int_to_ptr.vmem [resolvable:$true] %s208_s5 }
  0x21   : > { %p681_p8 = scmp.ne.s32.totalorder %s679_s8, %s680_s9  ;;  %s685_s13 = scalar_lea.hbm %s1091_s2, 16 }
  0x22   : > { %p686_p0 = scmp.lt.s32.totalorder %s679_s8, %s1091_s2  ;;  %p687_p1 = scmp.lt.s32.totalorder %s685_s13, %s680_s9 }
  0x23   : > { %p683_p11 = pnand %p681_p8, %p652_p12 }
  0x24   : > { %p688_p2 = por %p687_p1, %p686_p0 }
  0x25   : > { %p684_p13 = pneg %p683_p11 }
  0x27   : > { %p689_p4 = pnand %p688_p2, %p684_p13 }
  0x29   : > { %692 = shalt.err (!%p689_p4)
}
  0x2a   : > { %580 = dma.hbm_to_vmem [thread:$0]  (!%p944_p10), %s207_s11, 128, %s209_s5, [#allocation6]  }
  0x2b   : > { %p137_p12 = scmp.eq.s32.totalorder %s543_s21, 1  ;;  %s37_s30 = sadd.s32 1, %s852_s19 }
  0x2c   : > { %p39_p6 = scmp.ge.s32.totalorder %s37_s30, 2  ;;  %s46_s6 = sadd.s32 1, %s844_s17 }
  0x2d   : > { %p53_p8 = scmp.ne.s32.totalorder %s844_s17, %s840_s16  ;;  %p54_p11 = scmp.eq.s32.totalorder %s856_s20, 0 }
  0x2e   : > { %s1105_s30 = smov (%p39_p6, %s37_s30), 0  ;;  %p592_p0 = scmp.lt.s32.totalorder %s856_s20, 2 }
  0x2f   : > { %p992_p13 = por %p137_p12, %p53_p8  ;;  %s41_s22 = ssub.s32 %s852_s19, %s1105_s30 }
  0x30   : > { %s219_s27 = sand.u32 1, %s844_s17   ;;  %p44_p10 = scmp.eq.s32.totalorder %s41_s22, 0 }
  0x31   : > { %p55_p1 = por %p54_p11, %p53_p8  ;;  %s549_s11 = sshll.u32 %s219_s27, 3 }
  0x32   : > { %s550_s21 = sshll.u32 %s852_s19, 3  ;;  %s223_s10 = scalar_lea.vmem [#allocation2], %s549_s11 }
  0x33   : > { %s1002_s28 = scalar_select %p44_p10, %s844_s17, %s46_s6  }
  0x34   : > { %s228_s8 = scalar_lea.hbm %s1089_s0, %s550_s21  ;;  %s232_s12 = sshll.u32 %s223_s10, 4  ;;  %s233_s12 = int_to_ptr.vmem [resolvable:$true] %s232_s12 }
  0x35   : > { %s230_s9 = sshll.u32 %s228_s8, 4  ;;  %p582_p2 = pnand %p592_p0, %p55_p1  ;;  %s231_s9 = int_to_ptr.hbm [resolvable:$true] %s230_s9 }
  0x36   : > { %s220_s13 = scalar_lea.sflag [#allocation3], %s219_s27  ;;  %241 = sbr.rel (%p931_p7) target bundleno = 587 (0x24b), region = 32 }
  0x37   : > { %584 = dma.hbm_to_vmem [thread:$0]  (!%p582_p2), %s231_s9, 128, %s233_s12, %s220_s13  }
  0x38   : > { %s1012_s14 = sand.u32 (!%p931_p7), 1, %s840_s16  }
  0x39   : > { %s1015_s18 = sshll.u32 (!%p931_p7), %s1012_s14, 3  ;;  %s244_s6 = scalar_lea.sflag (!%p931_p7), [#allocation3], %s1012_s14 }
  0x3a   : > { %s247_s22 = scalar_lea.vmem (!%p931_p7), [#allocation2], %s1015_s18 }
  0x3b   : > { %819 = dma.done.wait (%p919_p3), %s244_s6, 128  }
  0x3c   : > { %821 = vsyncadd (%p919_p3), %s244_s6, 4294967168 }
  0x3d   : > { %823 = dma.done.wait (%p919_p3), [#allocation6], 256  }
  0x3e   : > { %825 = vsyncadd (%p919_p3), [#allocation6], 4294967040  ;;  %vm291_vm0 = vcmask 261120   ;;  %v289_v0 = vld [vmem:[#allocation5] sm:$0xff]  ;;  %v288_v1 = vld [vmem:[%s247_s22] sm:$0xff]  ;;  %vm319_vm1 = vcmask 64512   ;;  %s401_s27 = scalar_lea.hbm %s1093_s4, %s929_s25 }
  0x3f   : > { %555 = vmatpush.xpose.msk.msra.mxu0 %vm291_vm0, %v289_v0  ;;  %v290_v10 = vld [vmem:[#allocation7] sm:$0xff]  ;;  %s287_s11 = scalar_lea.vmem [#allocation9], %s1015_s18  ;;  %s405_s29 = sshll.u32 %s401_s27, 4  ;;  %s406_s29 = int_to_ptr.hbm [resolvable:$true] %s405_s29 }
  0x40   : > { %362 = vmatpush.msra.mxu1 %v290_v10  ;;  %s403_s21 = sshll.u32 %s287_s11, 4  ;;  %s375_s5 = scalar_lea.sflag [#allocation10], %s1012_s14  ;;  %s404_s21 = int_to_ptr.vmem [resolvable:$true] %s403_s21 }
  0x41   : > { %s752_s8 = sshra.s32 %s406_s29, 4  ;;  %s758_s13 = scalar_lea.hbm %s1093_s4, 16  ;;  %s753_s8 = int_to_ptr.hbm [resolvable:$true] %s752_s8 }
  0x42   : > { %556 = vmatmul.msk.f32.vlgmr.msra.gmra.mxu0 %vm291_vm0, %v288_v1  ;;  %s754_s9 = scalar_lea.hbm %s753_s8, 8  ;;  %p759_p12 = scmp.lt.s32.totalorder %s753_s8, %s1093_s4 }
  0x43   : > { %p755_p3 = scmp.ne.s32.totalorder %s753_s8, %s754_s9  ;;  %p760_p6 = scmp.lt.s32.totalorder %s758_s13, %s754_s9 }
  0x45   : > { %p756_p7 = pnand %p755_p3, %p992_p13  ;;  %p761_p8 = por %p760_p6, %p759_p12 }
  0x47   : > { %p757_p4 = pneg %p756_p7 }
  0x49   : > { %p762_p11 = pnand %p761_p8, %p757_p4 }
  0xbf   : > { %v315_v2 = vpop.f32.mrf.mxu0 }
  0xc0   : > { %v318_v3 = vmul.f32 0.17677669, %v315_v2 }
  0xc2   : > { %v320_v4 = vsel %vm319_vm1, %v318_v3, -inf }
  0xc3   : > { %321 = vmax.xlane.f32.xlu0 %v320_v4 }
 0x136   : > { %v322_v5 = vpop.xlane.xlu0 %321 }
 0x137   : > { %v323_v6 = vsub.f32 %v318_v3, %v322_v5 }
 0x139   : > { %v324_v7 = vmul.f32 1.442695, %v323_v6 }
 0x13b   : > { %644 = vpow2.f32 %v324_v7 }
 0x141   : > { %v645_v8 = vpop.eup %644 }
 0x142   : > { %v326_v9 = vsel %vm319_vm1, %v645_v8, 0.0 }
 0x143   : > { %327 = vadd.xlane.f32.xlu0 %v326_v9 }
 0x1b6   : > { %v328_v11 = vpop.xlane.xlu0 %327 }
 0x1b7   : > { %646 = vrcp.f32 %v328_v11  ;;  %v340_v15 = vand.u32 2147483648, %v328_v11  ;;  %v338_v17 = vand.u32 2147483647, %v328_v11  ;;  %vm334_vm3 = vweird.f32 %v328_v11 }
 0x1b9   : > { %v341_v19 = vor.u32 1.1754944e-38, %v340_v15  ;;  %vm339_vm5 = vcmp.eq.f32.partialorder %v338_v17, 8.507059e+37 }
 0x1bd   : > { %v647_v12 = vpop.eup %646 }
 0x1be   : > { %v330_v13 = vmul.f32 %v647_v12, %v328_v11  ;;  %vm335_vm2 = vweird.f32 %v647_v12 }
 0x1bf   : > { %vm336_vm4 = vmor %vm334_vm3, %vm335_vm2 }
 0x1c0   : > { %v331_v14 = vsub.f32 1.0, %v330_v13 }
 0x1c2   : > { %v332_v16 = vmul.f32 %v647_v12, %v331_v14 }
 0x1c4   : > { %v333_v18 = vadd.f32 %v647_v12, %v332_v16 }
 0x1c6   : > { %v337_v20 = vsel %vm336_vm4, %v647_v12, %v333_v18 }
 0x1c7   : > { %v342_v21 = vsel %vm339_vm5, %v341_v19, %v337_v20 }
 0x1c8   : > { %v343_v22 = vmul.f32 %v645_v8, %v342_v21 }
 0x1ca   : > { %557 = vmatmul.msk.f32.vlgmr.msra.gmra.mxu1 %vm319_vm1, %v343_v22  ;;  %368 = vst.msk [vmem:[%s287_s11] sm:$0xff] %vm319_vm1, %v343_v22 }
 0x1cb   : > { %765 = shalt.err (!%p762_p11)
}
 0x1cc   : > { %571 = dma.vmem_to_hbm [thread:$0]  (%p992_p13), %s404_s21, 128, %s406_s29, %s375_s5  }
 0x1cd   : > { %s386_s27 = scalar_lea.hbm %s1092_s3, %s929_s25  ;;  %s280_s11 = scalar_lea.vmem [#allocation8], %s1015_s18 }
 0x1ce   : > { %s388_s10 = sshll.u32 %s280_s11, 4  ;;  %s390_s12 = sshll.u32 %s386_s27, 4  ;;  %s389_s10 = int_to_ptr.vmem [resolvable:$true] %s388_s10  ;;  %s391_s12 = int_to_ptr.hbm [resolvable:$true] %s390_s12 }
 0x1cf   : > { %s370_s8 = scalar_lea.sflag [#allocation4], %s1012_s14  ;;  %s780_s9 = sshra.s32 %s391_s12, 4  ;;  %s781_s9 = int_to_ptr.hbm [resolvable:$true] %s780_s9 }
 0x1d0   : > { %s782_s13 = scalar_lea.hbm %s781_s9, 8  ;;  %s786_s25 = scalar_lea.hbm %s1092_s3, 16 }
 0x1d1   : > { %p783_p0 = scmp.ne.s32.totalorder %s781_s9, %s782_s13  ;;  %p787_p2 = scmp.lt.s32.totalorder %s781_s9, %s1092_s3 }
 0x1d2   : > { %p788_p3 = scmp.lt.s32.totalorder %s786_s25, %s782_s13 }
 0x1d3   : > { %p784_p10 = pnand %p783_p0, %p992_p13 }
 0x1d4   : > { %p789_p7 = por %p788_p3, %p787_p2 }
 0x1d5   : > { %p785_p1 = pneg %p784_p10 }
 0x1d7   : > { %p790_p4 = pnand %p789_p7, %p785_p1 }
 0x247   : > { %v364_v23 = vpop.f32.mrf.mxu1 }
 0x248   : > { %367 = vst.msk [vmem:[%s280_s11] sm:$0xff] %vm291_vm0, %v364_v23 }
 0x249   : > { %793 = shalt.err (!%p790_p4)
}
 0x24a   : > { %570 = dma.vmem_to_hbm [thread:$0]  (%p992_p13), %s389_s10, 128, %s391_s12, %s370_s8  }
 0x24b PF: > { %s417_s14 = sand.u32 1, %s836_s15   ;;  %p586_p12 = pnand %p548_p9, %p924_p5 }
 0x24c   : > { %s418_s6 = scalar_lea.sflag [#allocation4], %s417_s14 }
 0x24d   : > { %p587_p6 = pneg %p586_p12 }
 0x24f   : > { %827 = dma.done.wait (%p587_p6), %s418_s6, 128  }
 0x250   : > { %829 = vsyncadd (%p587_p6), %s418_s6, 4294967168  ;;  %s428_s22 = scalar_lea.sflag [#allocation10], %s417_s14 }
 0x251   : > { %831 = dma.done.wait (%p587_p6), %s428_s22, 128  }
 0x252   : > { %833 = vsyncadd (%p587_p6), %s428_s22, 4294967168  ;;  %s25_s20 = sadd.s32 1, %s856_s20   ;;  %s1099_s15 = smov %s840_s16 }
 0x253   : > { %p22_p8 = scmp.ge.s32.totalorder %s25_s20, 4   ;;  %s1100_s16 = smov %s844_s17 }
 0x254   : > { %s1101_s17 = smov %s1002_s28  ;;  %s1102_s18 = smov %s852_s19 }
 0x255   : > { %s1103_s19 = smov %s1105_s30  ;;  %24 = sbr.rel (!%p22_p8) target bundleno = 9 (0x9), region = 104 }
 0x25a   :  { %434 = vsyncpa [#allocation3], 1 }
 0x25b   :  { %436 = vsyncpa [#allocation3 + $0x1], 1 }
 0x25c   :  { %437 = vsyncpa [#allocation6], 1 }
 0x25d   :  { %438 = vsyncpa [#allocation4], 1 }
 0x25e   :  { %440 = vsyncpa [#allocation4 + $0x1], 1 }
 0x25f   :  { %441 = vsyncpa [#allocation10], 1 }
 0x260   :  { %443 = vsyncpa [#allocation10 + $0x1], 1 }

</bundles_post_ra>
